<compile_context>
chip_gen: v5e
topology: v5e:2x2
jax: 0.10.0
libtpu: 0.0.40
codegen_flags: <defaults>
</compile_context>

<pallas_src>
import numpy as np
import jax
import jax.numpy as jnp
from jax.experimental import pallas as pl
from jax.experimental.pallas import tpu as pltpu


# ----------------------------------------------------------------------------
# Deterministic port of the Masksembles mask-generation utilities (numpy glue).
# The original uses an unseeded RNG; here we seed it so the script is
# reproducible. This is parameter setup, not the hot path.
# ----------------------------------------------------------------------------
def _generate_masks(m: int, n: int, s: float, rng: np.random.Generator) -> np.ndarray:
    total_positions = int(m * s)
    masks = []
    for _ in range(n):
        new_vector = np.zeros([total_positions])
        idx = rng.choice(total_positions, m, replace=False)
        new_vector[idx] = 1
        masks.append(new_vector)
    masks = np.array(masks)
    return masks[:, ~np.all(masks == 0, axis=0)]


def generate_masks(m: int, n: int, s: float, rng: np.random.Generator) -> np.ndarray:
    masks = _generate_masks(m, n, s, rng)
    expected_size = int(m * s * (1 - (1 - 1 / s) ** n))
    while masks.shape[1] != expected_size:
        masks = _generate_masks(m, n, s, rng)
    return masks


def generation_wrapper(c: int, n: int, scale: float, rng: np.random.Generator) -> np.ndarray:
    if c < 10:
        raise ValueError(f"channels must be >= 10, got {c}")
    if scale > 6.0:
        raise ValueError(f"scale must be <= 6, got {scale}")
    active_features = int(int(c) / (scale * (1 - (1 - 1 / scale) ** n)))
    masks = generate_masks(active_features, n, scale, rng)
    up = 4 * scale
    down = max(0.2 * scale, 1.0)
    s = (down + up) / 2
    im_s = -1
    while im_s != c:
        masks = generate_masks(active_features, n, s, rng)
        im_s = masks.shape[-1]
        if im_s < c:
            down = s
            s = (down + up) / 2
        elif im_s > c:
            up = s
            s = (down + up) / 2
    return masks


# ----------------------------------------------------------------------------
# Pallas kernel: group-tiled broadcasted mask multiply.
# ----------------------------------------------------------------------------
def _round_up(x: int, m: int) -> int:
    return (x + m - 1) // m * m


def _make_mask2d_kernel(mask_on_rows: bool, multi_row: bool, multi_lane: bool):
    """Build kernel: o = x * m, with the mask broadcast along rows or lanes."""

    def kernel(m_ref, x_ref, o_ref):
        # m_ref: resident mask table (num_masks, R_pad, 1) or (num_masks, 1, L_pad)
        # x_ref / o_ref: (1, tr, tl) tile of the current mask group's data
        g = pl.program_id(0)                                   # mask-group index
        if mask_on_rows:
            if multi_row:
                tr = x_ref.shape[1]
                start = pl.multiple_of(pl.program_id(1) * tr, tr)
                m = m_ref[pl.ds(g, 1), pl.ds(start, tr), :]    # (1, tr, 1)
            else:
                m = m_ref[pl.ds(g, 1), :, :]                   # (1, rows, 1)
        else:
            if multi_lane:
                tl = x_ref.shape[2]
                start = pl.multiple_of(pl.program_id(2) * tl, tl)
                m = m_ref[pl.ds(g, 1), :, pl.ds(start, tl)]    # (1, 1, tl)
            else:
                m = m_ref[pl.ds(g, 1), :, :]                   # (1, 1, lanes)
        o_ref[...] = x_ref[...] * m                            # broadcast VPU multiply

    return kernel


def mask2d_forward(
    x: jax.Array,
    masks: jax.Array,
    num_masks: int,
    *,
    block_budget_bytes: int | None = None,
) -> jax.Array:
    """x: (B, C, H, W) NCHW, masks: (num_masks, C). Returns (B, C, H, W)."""
    B, C, H, W = x.shape
    if B % num_masks != 0:
        raise ValueError("batch must be divisible by num_masks")
    gs = B // num_masks
    HW = H * W
    itemsize = x.dtype.itemsize
    sub = max(8, 32 // itemsize)              # sublane granularity for this dtype

    # ---- per-generation VMEM sizing (v7x: 64 MiB/TC, v5e/v6e: 128 MiB) ------
    try:
        vmem_cap = int(pltpu.get_tpu_info().vmem_capacity_bytes)
    except Exception:
        vmem_cap = 64 * 1024 * 1024           # conservative default (v7x per-TC)
    vmem_limit = min(vmem_cap * 3 // 4, 96 * 1024 * 1024)

    # ---- choose mask orientation ---------------------------------------------
    # Estimated resident-mask VMEM footprint (a trailing size-1 axis pads to a
    # full 128-lane tile; a size-1 sublane axis pads to `sub`).
    row_mask_bytes = num_masks * _round_up(gs * C, sub) * 128 * itemsize
    lane_mask_bytes = num_masks * sub * _round_up(C * HW, 128) * itemsize
    mask_on_rows = HW >= 128 and (
        row_mask_bytes <= 4 * 1024 * 1024 or row_mask_bytes <= lane_mask_bytes)

    if mask_on_rows:
        R, LANES = gs * C, HW
        mvec = jnp.tile(masks.astype(x.dtype), (1, gs))          # (num_masks, gs*C)
        mask_bytes = row_mask_bytes
    else:
        R, LANES = gs, C * HW
        mvec = jnp.repeat(masks.astype(x.dtype), HW, axis=1)     # (num_masks, C*HW)
        mask_bytes = lane_mask_bytes
    x3 = x.reshape(num_masks, R, LANES)

    if block_budget_bytes is None:
        # 4 live blocks (double-buffered in + out) + resident mask + scratch headroom.
        block_budget_bytes = min(
            8 * 1024 * 1024,
            max(512 * 1024, (vmem_limit - mask_bytes - 2 * 1024 * 1024) // 4))

    # ---- lane tile: multiple of 128 (or the full extent when LANES < 128) ----
    tl = LANES if LANES < 128 else min(_round_up(LANES, 128), 1024)

    # ---- row tile: multiple of `sub`, sized by the block budget ---------------
    tr_cap = max(sub, (block_budget_bytes // max(1, tl * itemsize)) // sub * sub)
    tr = min(_round_up(R, sub), tr_cap)
    if tr >= R:
        tr = R                                # full-extent row block (always legal)
    n_r = pl.cdiv(R, tr)

    # If one row tile already covers all rows and budget remains, widen lanes.
    if n_r == 1 and LANES >= 128:
        wide = (block_budget_bytes // max(1, tr * itemsize)) // 128 * 128
        tl = min(_round_up(LANES, 128), max(tl, wide))
    n_j = pl.cdiv(LANES, tl)

    # ---- keep >= 4 parallel steps so both v7x TensorCores get balanced work --
    while num_masks * n_r * n_j < 4 and tr > sub and tr % sub == 0:
        tr = max(sub, _round_up(tr // 2, sub))
        n_r = pl.cdiv(R, tr)

    # ---- resident mask table, padded so in-kernel pl.ds slices stay in-bounds -
    if mask_on_rows:
        row_pad = n_r * tr
        if row_pad > R:
            mvec = jnp.pad(mvec, ((0, 0), (0, row_pad - R)))
        m3 = mvec.reshape(num_masks, row_pad, 1)
    else:
        lane_pad = n_j * tl
        if lane_pad > LANES:
            mvec = jnp.pad(mvec, ((0, 0), (0, lane_pad - LANES)))
        m3 = mvec.reshape(num_masks, 1, lane_pad)

    x_spec = pl.BlockSpec((1, tr, tl), lambda g, r, j: (g, r, j))
    o_spec = pl.BlockSpec((1, tr, tl), lambda g, r, j: (g, r, j))
    m_spec = pl.BlockSpec(memory_space=pltpu.MemorySpace.VMEM)   # resident, not pipelined

    cost = pl.CostEstimate(
        flops=B * C * HW,
        transcendentals=0,
        bytes_accessed=2 * B * C * HW * itemsize + m3.size * itemsize,
    )

    out = pl.pallas_call(
        _make_mask2d_kernel(mask_on_rows, n_r > 1, n_j > 1),
        out_shape=jax.ShapeDtypeStruct((num_masks, R, LANES), x.dtype),
        grid=(num_masks, n_r, n_j),
        in_specs=[m_spec, x_spec],
        out_specs=o_spec,
        compiler_params=pltpu.CompilerParams(
            dimension_semantics=("parallel", "parallel", "parallel"),
            vmem_limit_bytes=vmem_limit,
        ),
        cost_estimate=cost,
    )(m3, x3)

    return out.reshape(B, C, H, W)


if __name__ == "__main__":
    # Masksembles requires channels >= 10.
    C = 16
    num_masks = 2
    scale = 2.0

    # Deterministic mask "parameter" init (replaces the nn.Parameter buffer).
    np_rng = np.random.default_rng(0)
    masks_np = generation_wrapper(C, num_masks, scale, np_rng)  # (num_masks, C), 0/1
    masks = jnp.asarray(masks_np, dtype=jnp.float32)

    key = jax.random.PRNGKey(0)
    k1, k2 = jax.random.split(key)

    # Case 1: f32, HW >= 128 (row-mask path, lane-dense 128-multiple tiles).
    B, H, W = 4, 16, 16
    x1 = jax.random.normal(k1, (B, C, H, W), dtype=jnp.float32)
    out1 = jax.block_until_ready(mask2d_forward(x1, masks, num_masks))
    gidx = jnp.arange(B) // (B // num_masks)
    ref1 = x1 * masks[gidx][:, :, None, None].astype(x1.dtype)
    np.testing.assert_allclose(
        np.asarray(out1.astype(jnp.float32)), np.asarray(ref1.astype(jnp.float32)),
        rtol=0, atol=0)
    assert out1.shape == (B, C, H, W) and out1.dtype == x1.dtype

    # Case 2: bf16, HW < 128 (lane-mask path: channels flattened onto lanes).
    B2, H2, W2 = 4, 7, 7
    x2 = jax.random.normal(k2, (B2, C, H2, W2), dtype=jnp.bfloat16)
    out2 = jax.block_until_ready(mask2d_forward(x2, masks, num_masks))
    gidx2 = jnp.arange(B2) // (B2 // num_masks)
    ref2 = x2 * masks[gidx2][:, :, None, None].astype(x2.dtype)
    np.testing.assert_allclose(
        np.asarray(out2.astype(jnp.float32)), np.asarray(ref2.astype(jnp.float32)),
        rtol=0, atol=0)
    assert out2.shape == (B2, C, H2, W2) and out2.dtype == x2.dtype

    print("KERNEL_OK")
</pallas_src>

<mosaic_0001>
module attributes {stable_mosaic.version = 11 : i64} {
  func.func @kernel(%arg0: i32, %arg1: i32, %arg2: i32, %arg3: memref<2x32x1xf32, #tpu.memory_space<vmem>>, %arg4: memref<1x16x256xf32, #tpu.memory_space<vmem>>, %arg5: memref<1x16x256xf32, #tpu.memory_space<vmem>>) attributes {dimension_semantics = [#tpu.dimension_semantics<parallel>, #tpu.dimension_semantics<parallel>, #tpu.dimension_semantics<parallel>], iteration_bounds = array<i64: 2, 2, 1>, scalar_prefetch = 0 : i64, scratch_operands = 0 : i64, tpu.core_type = #tpu.core_type<tc>, window_params = [{pipeline_mode = #tpu.pipeline_mode<synchronous>, transform_indices = @transform_0, window_bounds = array<i64: 2, 32, 1>}, {transform_indices = @transform_1, window_bounds = array<i64: 1, 16, 256>}, {transform_indices = @transform_2, window_bounds = array<i64: 1, 16, 256>}]} {
    %c16_i32 = arith.constant 16 : i32
    %0 = arith.muli %arg1, %c16_i32 : i32
    %1 = tpu.assume_multiple %0, 16 : i32
    %2 = arith.index_cast %arg0 : i32 to index
    %3 = arith.index_cast %1 : i32 to index
    %c0 = arith.constant 0 : index
    %4 = vector.load %arg3[%2, %3, %c0] : memref<2x32x1xf32, #tpu.memory_space<vmem>>, vector<1x16x1xf32>
    %c0_0 = arith.constant 0 : index
    %c0_1 = arith.constant 0 : index
    %c0_2 = arith.constant 0 : index
    %5 = vector.load %arg4[%c0_0, %c0_1, %c0_2] : memref<1x16x256xf32, #tpu.memory_space<vmem>>, vector<1x16x256xf32>
    %6 = vector.broadcast %4 : vector<1x16x1xf32> to vector<1x16x256xf32>
    %7 = arith.mulf %5, %6 : vector<1x16x256xf32>
    %c0_3 = arith.constant 0 : index
    %c0_4 = arith.constant 0 : index
    %c0_5 = arith.constant 0 : index
    %8 = vector.load %arg5[%c0_3, %c0_4, %c0_5] : memref<1x16x256xf32, #tpu.memory_space<vmem>>, vector<1x16x256xf32>
    tpu.vector_store %arg5[%c0_3, %c0_4, %c0_5], %7 {strides = array<i32>} : memref<1x16x256xf32, #tpu.memory_space<vmem>>, vector<1x16x256xf32>,
    return
  }
  func.func @transform_0(%arg0: i32, %arg1: i32, %arg2: i32) -> (i32, i32, i32) {
    %c0_i32 = arith.constant 0 : i32
    %c0_i32_0 = arith.constant 0 : i32
    %c0_i32_1 = arith.constant 0 : i32
    %c0_i32_2 = arith.constant 0 : i32
    return %c0_i32, %c0_i32_0, %c0_i32_1 : i32, i32, i32
  }
  func.func @transform_1(%arg0: i32, %arg1: i32, %arg2: i32) -> (i32, i32, i32) {
    %c0_i32 = arith.constant 0 : i32
    return %arg0, %arg1, %arg2 : i32, i32, i32
  }
  func.func @transform_2(%arg0: i32, %arg1: i32, %arg2: i32) -> (i32, i32, i32) {
    %c0_i32 = arith.constant 0 : i32
    return %arg0, %arg1, %arg2 : i32, i32, i32
  }
}

</mosaic_0001>

<bundles_post_ra>
// kernel: tpu_custom_call.1
= control target key start
LH: loop header
LB: loop body
LE: loop exit
PB: predicated region body
PF: predicated region fallthrough
CT: control target
= control target key end

     0   :  { %7 = vsyncpa [#allocation3], 0  ;;  %s754_s0 = inlined_call_operand.vmem [shape: f32[2,32,1], index: 0, kind: input, shape index: {}]   ;;  %s755_s1 = inlined_call_operand.hbm [shape: f32[2,32,256], index: 1, kind: input, shape index: {}]   ;;  %s756_s2 = inlined_call_operand.hbm [shape: f32[2,32,256], index: 2, kind: output, shape index: {}]  }
   0x1   :  { %9 = vsyncpa [#allocation3 + $0x1], 0 }
   0x2   :  { %10 = vsyncpa [#allocation4], 0 }
   0x3   :  { %12 = vsyncpa [#allocation4 + $0x1], 0  ;;  %s607_s9 = smov 0   ;;  %s609_s10 = smov 0  }
   0x4   :  { %s611_s11 = smov 0   ;;  %s613_s12 = smov 0  }
   0x5   :  { %s615_s13 = smov 0   ;;  %s617_s14 = smov 0  }
   0x6   :  { %s619_s15 = smov 0   ;;  %s621_s16 = smov 0  }
   0x7 LB: > { %s350_s17 = sadd.s32 4294967295, %s585_s16   ;;  %s351_s18 = sadd.s32 4294967294, %s585_s16   ;;  %s585_s16 = sphi %s621_s16, %s18_s16   ;;  %s581_s15 = sphi %s619_s15, %s773_s15   ;;  %s577_s14 = sphi %s617_s14, %s772_s14   ;;  %s573_s13 = sphi %s615_s13, %s771_s13   ;;  %s569_s12 = sphi %s613_s12, %s770_s12   ;;  %s565_s11 = sphi %s611_s11, %s769_s11   ;;  %s561_s10 = sphi %s609_s10, %s768_s10   ;;  %s557_s9 = sphi %s607_s9, %s767_s9  }
   0x8   : > { %s33_s19 = sadd.s32 1, %s577_s14  ;;  %s37_s20 = sadd.s32 1, %s581_s15 }
   0x9   : > { %p35_p0 = scmp.ge.s32.totalorder %s33_s19, 2  ;;  %s69_s21 = sadd.s32 1, %s565_s11 }
   0xa   : > { %p76_p1 = scmp.ne.s32.totalorder %s565_s11, %s561_s10  ;;  %p77_p2 = scmp.eq.s32.totalorder %s585_s16, 0 }
   0xb   : > { %s775_s19 = smov (%p35_p0, %s33_s19), 0  ;;  %s777_s20 = smov (!%p35_p0, %s37_s20), %s581_s15 }
   0xc   : > { %759 = sst [smem:[#allocation8_spill]] %s775_s19  ;;  %s63_s22 = ssub.s32 %s577_s14, %s775_s19 }
   0xd   : > { %p660_p3 = por %p77_p2, %p76_p1  ;;  %p39_p4 = scmp.ge.s32.totalorder %s777_s20, 2 }
   0xe   : > { %p82_p5 = scmp.ne.s32.totalorder %s561_s10, %s557_s9  ;;  %p83_p6 = scmp.eq.s32.totalorder %s350_s17, 0 }
   0xf   : > { %p110_p7 = scmp.eq.s32.totalorder %s350_s17, 3  ;;  %s779_s20 = smov (%p39_p4, %s777_s20), 0 }
  0x10   : > { %761 = sst [smem:[#allocation9_spill]] %s779_s20  ;;  %p668_p8 = por %p83_p6, %p82_p5 }
  0x11   : > { %p672_p9 = por %p110_p7, %p76_p1  ;;  %s62_s26 = ssub.s32 %s581_s15, %s779_s20 }
  0x12   : > { %p116_p10 = scmp.eq.s32.totalorder %s351_s18, 3  ;;  %s64_s27 = sor.u32 %s63_s22, %s62_s26 }
  0x13   : > { %p67_p11 = scmp.eq.s32.totalorder %s64_s27, 0  ;;  %p385_p13 = scmp.lt.s32.totalorder %s585_s16, 4 }
  0x14   : > { %p678_p12 = por %p116_p10, %p82_p5  ;;  %s139_s29 = sand.u32 1, %s565_s11  }
  0x15   : > { %s685_s30 = scalar_select %p67_p11, %s565_s11, %s69_s21  }
  0x16   : > { %s354_s3 = sshll.u32 %s139_s29, 5  ;;  %s371_s4 = sshll.u32 %s577_s14, 2 }
  0x17   : > { %s357_s5 = sshll.u32 %s581_s15, 3  ;;  %s143_s6 = scalar_lea.vmem [#allocation2], %s354_s3 }
  0x18   : > { %s156_s7 = sshll.u32 %s143_s6, 4  ;;  %s151_s8 = sadd.s32 %s371_s4, %s357_s5  ;;  %s157_s7 = int_to_ptr.vmem [resolvable:$true] %s156_s7 }
  0x19   : > { %s358_s17 = sshll.u32 %s151_s8, 3  ;;  %p378_p0 = pnand %p385_p13, %p660_p3 }
  0x1a   : > { %s153_s26 = scalar_lea.hbm %s755_s1, %s358_s17  ;;  %s140_s21 = scalar_lea.sflag [#allocation3], %s139_s29 }
  0x1b   : > { %s154_s27 = sshll.u32 %s153_s26, 4  ;;  %s587_s20 = smov 256   ;;  %s155_s27 = int_to_ptr.hbm [resolvable:$true] %s154_s27 }
  0x1c   : > { %s588_s19 = smov 16   ;;  %p359_p1 = scmp.ge.s32.totalorder %s585_s16, 1 }
  0x1d   : > { %380 = dma.hbm_to_vmem [thread:$0]  (!%p378_p0), %s155_s27, 512, %s157_s7, %s140_s21, %s587_s20, %s587_s20, %s588_s19  }
  0x1e   : > { %p164_p2 = scmp.lt.s32.totalorder %s585_s16, 5 }
  0x20   : > { %p165_p4 = pnand %p359_p1, %p164_p2 }
  0x21   : > { %s697_s3 = sand.u32 (!%p165_p4), 1, %s561_s10  }
  0x22   : > { %168 = sbr.rel (%p165_p4) target bundleno = 174 (0xae), region = 28  ;;  %s360_s23 = sshll.u32 (!%p165_p4), %s697_s3, 5 }
  0x23   : > { %s171_s4 = scalar_lea.sflag (!%p165_p4), [#allocation3], %s697_s3  ;;  %s174_s5 = scalar_lea.vmem (!%p165_p4), [#allocation2], %s360_s23 }
  0x27   : > { %548 = dma.done.wait (%p668_p8), %s171_s4, 512  }
  0x28   : > { %550 = vsyncadd (%p668_p8), %s171_s4, 4294966784  ;;  %s362_s19 = sshll.u32 %s569_s12, 4  ;;  %s363_s20 = sshll.u32 %s573_s13, 5  ;;  %v589_v0 = vmov 0   ;;  %v206_v3 = vld [vmem:[%s174_s5] sm:$0xff]  ;;  %v207_v4 = vld [vmem:[%s174_s5 + $0x8] sm:$0xff] }
  0x29   : > { %456 = vset.pattern.permute.xlu0 %v589_v0  ;;  %s202_s29 = sadd.s32 %s363_s20, %s362_s19  ;;  %s372_s17 = sshll.u32 %s569_s12, 2  ;;  %v208_v8 = vld [vmem:[%s174_s5 + $0x10] sm:$0xff]  ;;  %v209_v9 = vld [vmem:[%s174_s5 + $0x18] sm:$0xff] }
  0x2a   : > { %s203_s8 = scalar_lea.vmem %s754_s0, %s202_s29  ;;  %s367_s24 = sshll.u32 %s573_s13, 3 }
  0x2b   : > { %v204_v1 = vld [vmem:[%s203_s8] sm:$0xff]  ;;  %v205_v2 = vld [vmem:[%s203_s8 + $0x8] sm:$0xff]  ;;  %s243_s18 = sadd.s32 %s372_s17, %s367_s24  ;;  %s195_s26 = scalar_lea.vmem [#allocation5], %s360_s23 }
  0x2c   : > { %212 = vperm.xlu0 %456, %v204_v1   ;;  %s368_s22 = sshll.u32 %s243_s18, 3  ;;  %s246_s19 = sshll.u32 %s195_s26, 4  ;;  %s247_s19 = int_to_ptr.vmem [resolvable:$true] %s246_s19 }
  0x2d   : > { %s245_s4 = scalar_lea.hbm %s756_s2, %s368_s22  ;;  %s229_s13 = scalar_lea.sflag [#allocation4], %s697_s3 }
  0x2e   : > { %s248_s12 = sshll.u32 %s245_s4, 4  ;;  %s507_s5 = scalar_lea.hbm %s756_s2, 128  ;;  %s249_s12 = int_to_ptr.hbm [resolvable:$true] %s248_s12 }
  0x2f   : > { %s501_s23 = sshra.s32 %s249_s12, 4  ;;  %s502_s23 = int_to_ptr.hbm [resolvable:$true] %s501_s23 }
  0x30   : > { %s503_s20 = scalar_lea.hbm %s502_s23, 32  ;;  %p508_p7 = scmp.lt.s32.totalorder %s502_s23, %s756_s2 }
  0x31   : > { %p504_p3 = scmp.ne.s32.totalorder %s502_s23, %s503_s20  ;;  %p509_p8 = scmp.lt.s32.totalorder %s507_s5, %s503_s20 }
  0x33   : > { %p505_p5 = pnand %p504_p3, %p672_p9  ;;  %p510_p10 = por %p509_p8, %p508_p7 }
  0x34   : > { %217 = vperm.xlu0 %456, %v205_v2  }
  0x35   : > { %p506_p6 = pneg %p505_p5 }
  0x37   : > { %p511_p11 = pnand %p510_p10, %p506_p6 }
  0x9e   : > { %v213_v5 = vpop.permute.xlu0 %212 }
  0x9f   : > { %v220_v6 = vmul.f32 %v213_v5, %v206_v3  ;;  %v221_v7 = vmul.f32 %v213_v5, %v207_v4 }
  0xa1   : > { %224 = vst [vmem:[%s195_s26] sm:$0xff] %v220_v6 }
  0xa2   : > { %225 = vst [vmem:[%s195_s26 + $0x8] sm:$0xff] %v221_v7 }
  0xa6   : > { %v218_v10 = vpop.permute.xlu0 %217 }
  0xa7   : > { %v222_v11 = vmul.f32 %v218_v10, %v208_v8  ;;  %v223_v12 = vmul.f32 %v218_v10, %v209_v9 }
  0xa9   : > { %226 = vst [vmem:[%s195_s26 + $0x10] sm:$0xff] %v222_v11 }
  0xaa   : > { %227 = vst [vmem:[%s195_s26 + $0x18] sm:$0xff] %v223_v12 }
  0xab   : > { %514 = shalt.err (!%p511_p11)
}
  0xac   : > { %s590_s3 = smov 256   ;;  %s591_s17 = smov 16  }
  0xad   : > { %375 = dma.vmem_to_hbm [thread:$0]  (%p672_p9), %s247_s19, 512, %s249_s12, %s229_s13, %s590_s3, %s590_s3, %s591_s17  }
  0xae PF: > { %p386_p13 = scmp.ge.s32.totalorder %s585_s16, 2  ;;  %s263_s24 = sand.u32 1, %s557_s9  }
  0xaf   : > { %s264_s18 = scalar_lea.sflag [#allocation4], %s263_s24 }
  0xb0   : > { %p382_p0 = pnand %p386_p13, %p678_p12 }
  0xb2   : > { %p383_p1 = pneg %p382_p0 }
  0xb4   : > { %552 = dma.done.wait (%p383_p1), %s264_s18, 512  }
  0xb5   : > { %554 = vsyncadd (%p383_p1), %s264_s18, 4294966784  ;;  %s18_s16 = sadd.s32 1, %s585_s16   ;;  %s765_s25 = sld [smem:[#allocation8_spill]] }
  0xb6   : > { %p15_p2 = scmp.ge.s32.totalorder %s18_s16, 6   ;;  %s766_s22 = sld [smem:[#allocation9_spill]] }
  0xb7   : > { %s767_s9 = smov %s561_s10  ;;  %s768_s10 = smov %s565_s11 }
  0xb8   : > { %s769_s11 = smov %s685_s30  ;;  %s770_s12 = smov %s577_s14 }
  0xb9   : > { %s771_s13 = smov %s581_s15  ;;  %17 = sbr.rel (!%p15_p2) target bundleno = 7 (0x7), region = 74 }
  0xbb   : > { %s772_s14 = smov %s765_s25 }
  0xbc   : > { %s773_s15 = smov %s766_s22 }
  0xbe   :  { %270 = vsyncpa [#allocation3], 1 }
  0xbf   :  { %272 = vsyncpa [#allocation3 + $0x1], 1 }
  0xc0   :  { %273 = vsyncpa [#allocation4], 1 }
  0xc1   :  { %275 = vsyncpa [#allocation4 + $0x1], 1 }

</bundles_post_ra>
